<compile_context>
chip_gen: v6e
topology: v6e:2x2x1
jax: 0.10.0
libtpu: 0.0.40
codegen_flags: <defaults>
</compile_context>

<pallas_src>
import jax
import jax.numpy as jnp
from jax.experimental import pallas as pl
from jax.experimental.pallas import tpu as pltpu


# --------------------------------------------------------------------------- #
# Kernel                                                                      #
# --------------------------------------------------------------------------- #
def _coordatt_kernel(x_ref, p_ref, w1_ref, b1_ref, wh_ref, bh_ref,
                     ww_ref, bw_ref, eh_ref, ew_ref, o_ref):
    H = eh_ref.shape[0]

    x = x_ref[...]                                             # (BT*C, HWp)

    # 1) H-pool + W-pool in one big matmul (K = HWp): cols [0:H] = mean over W,
    #    cols [H:H+W] = mean over H.  P's lane-padding rows are zero, so the
    #    padded x columns do not perturb the means.
    pooled = jnp.dot(x, p_ref[...],
                     preferred_element_type=jnp.float32)       # (BT*C, H+W)

    # 2) stem: conv1 (BatchNorm folded on host) + h_swish, one matmul.
    y = jnp.dot(w1_ref[...], pooled,
                preferred_element_type=jnp.float32) + b1_ref[...]   # (BT*mip, H+W)
    y = y * (jnp.clip(y + 3.0, 0.0, 6.0) * (1.0 / 6.0))

    # 3) conv_h / conv_w + sigmoid on the H / W column halves.
    a_h = jax.nn.sigmoid(
        jnp.dot(wh_ref[...], y[:, :H],
                preferred_element_type=jnp.float32) + bh_ref[...])  # (BT*oup, H)
    a_w = jax.nn.sigmoid(
        jnp.dot(ww_ref[...], y[:, H:],
                preferred_element_type=jnp.float32) + bw_ref[...])  # (BT*oup, W)

    # 4) expand gates to lane-dense (BT*oup, HWp) with 0/1 expander matmuls
    #    (oup == C, so gh/gw line up row-for-row with x).
    gh = jnp.dot(a_h, eh_ref[...], preferred_element_type=jnp.float32)
    gw = jnp.dot(a_w, ew_ref[...], preferred_element_type=jnp.float32)

    # 5) single lane-dense store of the whole block.
    o_ref[...] = (x * gh * gw).astype(o_ref.dtype)


# --------------------------------------------------------------------------- #
# Host-side helpers                                                           #
# --------------------------------------------------------------------------- #
def _pool_expand_mats(h, w, hwp, dtype=jnp.float32):
    """Averaging matrix P:(hwp, h+w) and 0/1 expanders Eh:(h, hwp), Ew:(w, hwp).
    Rows/cols for lane-padding positions (hw <= p < hwp) are zero."""
    hw = h * w
    pos = jnp.arange(hwp)
    valid = (pos < hw).astype(dtype)
    eq_h = (jnp.equal(pos[:, None] // w, jnp.arange(h)[None, :]).astype(dtype)
            * valid[:, None])                                  # (hwp, h)
    eq_w = (jnp.equal(pos[:, None] % w, jnp.arange(w)[None, :]).astype(dtype)
            * valid[:, None])                                  # (hwp, w)
    P = jnp.concatenate([eq_h / float(w), eq_w / float(h)], axis=1)   # (hwp, h+w)
    return P, eq_h.T, eq_w.T


def _tpu_vmem_and_cores():
    """Generation-aware VMEM capacity + TensorCore-count heuristic."""
    try:
        info = pltpu.get_tpu_info()
        cap = int(getattr(info, "vmem_capacity_bytes", 64 << 20))
    except Exception:
        cap = 64 << 20                      # conservative default (v7x-sized)
    # v7x exposes 64 MiB VMEM per TC and has 2 TCs/chip; v5e/v6e have 128 MiB, 1 TC.
    cores = 2 if cap <= (64 << 20) else 1
    return cap, cores


def _select_batch_tile(n, c, mip, h, w, hwp, vmem_cap, num_tc, max_tile):
    """Largest batch tile that (a) divides n (no padded-sample HBM waste),
    (b) keeps the (bt*c, hwp) block sublane-aligned or full-extent, (c) fits a
    VMEM budget that includes double-buffered in/out blocks, the in-kernel
    gh/gw slabs and the bt-dependent block-diagonal constants, and (d) on
    2-TensorCore parts prefers an even / >=2 grid-step count."""
    budget = max(vmem_cap - (8 << 20), 8 << 20)
    const_fixed = 4 * (hwp * (h + w) + (h + w) * hwp)          # P + Eh + Ew (f32)

    def need(bt):
        blocks = 7 * bt * c * hwp * 4      # 2x in + 2x out (double-buffer) + x/gh/gw temps
        consts = 2 * (const_fixed + 4 * (3 * bt * bt * mip * c + bt * (mip + 2 * c)))
        return blocks + consts

    cap_bt = max(1, min(max_tile, n))
    cands = [d for d in range(1, cap_bt + 1)
             if n % d == 0 and ((d * c) % 8 == 0 or d == n) and need(d) <= budget]
    if not cands:   # relax sublane alignment, keep divisor + VMEM constraints
        cands = [d for d in range(1, cap_bt + 1) if n % d == 0 and need(d) <= budget]
    if not cands:   # last resort: one sample per step
        cands = [1]
    if num_tc >= 2 and n >= 2:
        even = [d for d in cands if (n // d) % 2 == 0]
        multi = [d for d in cands if (n // d) >= 2]
        cands = even or multi or cands
    bt = max(cands)
    return bt, need(bt)


def coord_att(x, params, *, max_batch_tile=16):
    """x: (N, C, H, W) float32. params: dict of weights (see init_params)."""
    n, c, h, w = x.shape
    hw = h * w
    hwp = -(-hw // 128) * 128              # pad the spatial (lane) dim to 128k

    w1, b1 = params["w1"], params["b1"]
    bns, bnb = params["bn_scale"], params["bn_bias"]
    whc, bhc, wwc, bwc = params["wh"], params["bh"], params["ww"], params["bw"]
    mip = w1.shape[0]
    oup = whc.shape[0]
    assert oup == c, "CoordAtt gating (identity * a_w * a_h) requires oup == inp == C"

    # Fold eval-mode BatchNorm into conv1:  s*(w1 x + b1) + b == w1' x + b1'
    w1f = (bns * w1).astype(jnp.float32)           # (mip, C)
    b1f = (bns * b1 + bnb).astype(jnp.float32)     # (mip, 1)

    P, Eh, Ew = _pool_expand_mats(h, w, hwp)

    vmem_cap, num_tc = _tpu_vmem_and_cores()
    bt, vmem_need = _select_batch_tile(n, c, mip, h, w, hwp,
                                       vmem_cap, num_tc, max_batch_tile)
    n_steps = -(-n // bt)
    n_pad = n_steps * bt

    # Lane-dense layout: (n*c, hwp) rows grouped by sample; zero-pad lanes.
    x2 = x.reshape(n, c, hw)
    if hwp != hw:
        x2 = jnp.pad(x2, ((0, 0), (0, 0), (0, hwp - hw)))
    if n_pad != n:                         # only hit by the non-divisor fallback
        x2 = jnp.pad(x2, ((0, n_pad - n), (0, 0), (0, 0)))
    x2 = x2.reshape(n_pad * c, hwp)

    # Block-diagonal 1x1-conv weights: per-sample channel mixing as one matmul
    # in the (sample-major rows, spatial lanes) layout.
    eye = jnp.eye(bt, dtype=jnp.float32)
    w1_big = jnp.kron(eye, w1f)                                    # (bt*mip, bt*C)
    b1_big = jnp.tile(b1f, (bt, 1))                                # (bt*mip, 1)
    wh_big = jnp.kron(eye, whc.astype(jnp.float32))                # (bt*oup, bt*mip)
    bh_big = jnp.tile(bhc.astype(jnp.float32), (bt, 1))
    ww_big = jnp.kron(eye, wwc.astype(jnp.float32))
    bw_big = jnp.tile(bwc.astype(jnp.float32), (bt, 1))

    vmem_limit = int(min(vmem_cap - (2 << 20), max(vmem_need + (6 << 20), 32 << 20)))

    def run(single_buffer_consts):
        def cspec(a):
            if single_buffer_consts:
                # Grid-invariant operands: block index never changes, so a
                # single buffer suffices (saves VMEM vs. the default 2).
                return pl.BlockSpec(a.shape, lambda i: (0, 0),
                                    pipeline_mode=pl.Buffered(1))
            return pl.BlockSpec(a.shape, lambda i: (0, 0))

        call = pl.pallas_call(
            _coordatt_kernel,
            out_shape=jax.ShapeDtypeStruct((n_pad * c, hwp), x.dtype),
            grid_spec=pltpu.PrefetchScalarGridSpec(
                num_scalar_prefetch=0,
                grid=(n_steps,),
                in_specs=[
                    pl.BlockSpec((bt * c, hwp), lambda i: (i, 0)),   # x block
                    cspec(P),                                        # pooling matrix
                    cspec(w1_big), cspec(b1_big),                    # conv1 (BN folded)
                    cspec(wh_big), cspec(bh_big),                    # conv_h
                    cspec(ww_big), cspec(bw_big),                    # conv_w
                    cspec(Eh), cspec(Ew),                            # gate expanders
                ],
                out_specs=pl.BlockSpec((bt * c, hwp), lambda i: (i, 0)),
            ),
            compiler_params=pltpu.CompilerParams(
                dimension_semantics=("parallel",),
                vmem_limit_bytes=vmem_limit,
            ),
        )
        return jax.block_until_ready(
            call(x2, P, w1_big, b1_big, wh_big, bh_big, ww_big, bw_big, Eh, Ew))

    try:
        out = run(True)
    except Exception:
        # Fallback for jax versions without BlockSpec.pipeline_mode / Buffered(1).
        out = run(False)

    out = out.reshape(n_pad, c, hwp)[:n, :, :hw]
    return out.reshape(n, c, h, w)


def init_params(key, inp, oup, reduction=32):
    mip = max(8, inp // reduction)
    ks = jax.random.split(key, 6)
    # 1x1 conv weights stored as (out_ch, in_ch); biases as (out_ch, 1)
    w1 = jax.random.normal(ks[0], (mip, inp), jnp.float32) * 0.1
    b1 = jax.random.normal(ks[1], (mip, 1), jnp.float32) * 0.1
    wh = jax.random.normal(ks[2], (oup, mip), jnp.float32) * 0.1
    bh = jax.random.normal(ks[3], (oup, 1), jnp.float32) * 0.1
    ww = jax.random.normal(ks[4], (oup, mip), jnp.float32) * 0.1
    bw = jax.random.normal(ks[5], (oup, 1), jnp.float32) * 0.1
    # BatchNorm2d (inference semantics): gamma=1, beta=0, running_mean=0, running_var=1
    gamma = jnp.ones((mip, 1), jnp.float32)
    beta = jnp.zeros((mip, 1), jnp.float32)
    rmean = jnp.zeros((mip, 1), jnp.float32)
    rvar = jnp.ones((mip, 1), jnp.float32)
    eps = 1e-5
    bn_scale = gamma / jnp.sqrt(rvar + eps)
    bn_bias = beta - rmean * bn_scale
    return {"w1": w1, "b1": b1, "bn_scale": bn_scale, "bn_bias": bn_bias,
            "wh": wh, "bh": bh, "ww": ww, "bw": bw}


def coord_att_ref(x, p):
    """Pure-JAX reference (mirrors the PyTorch forward, eval-mode BN)."""
    x_h = jnp.mean(x, axis=3)                                    # (N, C, H)
    x_w = jnp.mean(x, axis=2)                                    # (N, C, W)
    y = jnp.concatenate([x_h, x_w], axis=2)                      # (N, C, H+W)
    y = jnp.einsum("oc,ncs->nos", p["w1"], y) + p["b1"][None]    # (N, mip, H+W)
    y = y * p["bn_scale"][None] + p["bn_bias"][None]
    y = y * (jnp.clip(y + 3.0, 0.0, 6.0) / 6.0)
    h = x.shape[2]
    yh, yw = y[:, :, :h], y[:, :, h:]
    a_h = jax.nn.sigmoid(jnp.einsum("om,nms->nos", p["wh"], yh) + p["bh"][None])  # (N, oup, H)
    a_w = jax.nn.sigmoid(jnp.einsum("om,nms->nos", p["ww"], yw) + p["bw"][None])  # (N, oup, W)
    return x * a_w[:, :, None, :] * a_h[:, :, :, None]


if __name__ == "__main__":
    def run_case(key, n, c, h, w, reduction=32):
        inp = oup = c
        kx, kp = jax.random.split(key)
        x = jax.random.normal(kx, (n, c, h, w), jnp.float32)
        params = init_params(kp, inp, oup, reduction)
        out = jax.block_until_ready(coord_att(x, params))
        ref = coord_att_ref(x, params)
        assert out.shape == (n, c, h, w)
        err = float(jnp.max(jnp.abs(out - ref)))
        assert jnp.allclose(out, ref, atol=1e-4, rtol=1e-4), f"mismatch vs reference: {err}"

    key = jax.random.PRNGKey(0)
    k1, k2 = jax.random.split(key)
    run_case(k1, 2, 4, 16, 16)   # primary small case (N,C,H,W)=(2,4,16,16)
    run_case(k2, 5, 8, 8, 8)     # exercises divisor-based batch tiling + HW lane padding
    print("KERNEL_OK")
</pallas_src>

<mosaic_0001>
module attributes {stable_mosaic.version = 11 : i64} {
  func.func @_coordatt_kernel(%arg0: i32, %arg1: memref<8x256xf32, #tpu.memory_space<vmem>>, %arg2: memref<256x32xf32, #tpu.memory_space<vmem>>, %arg3: memref<16x8xf32, #tpu.memory_space<vmem>>, %arg4: memref<16x1xf32, #tpu.memory_space<vmem>>, %arg5: memref<8x16xf32, #tpu.memory_space<vmem>>, %arg6: memref<8x1xf32, #tpu.memory_space<vmem>>, %arg7: memref<8x16xf32, #tpu.memory_space<vmem>>, %arg8: memref<8x1xf32, #tpu.memory_space<vmem>>, %arg9: memref<16x256xf32, #tpu.memory_space<vmem>>, %arg10: memref<16x256xf32, #tpu.memory_space<vmem>>, %arg11: memref<8x256xf32, #tpu.memory_space<vmem>>) attributes {dimension_semantics = [#tpu.dimension_semantics<parallel>], iteration_bounds = array<i64: 1>, scalar_prefetch = 0 : i64, scratch_operands = 0 : i64, tpu.core_type = #tpu.core_type<tc>, window_params = [{transform_indices = @transform_0, window_bounds = array<i64: 8, 256>}, {pipeline_mode = #tpu.pipeline_mode<synchronous>, transform_indices = @transform_1, window_bounds = array<i64: 256, 32>}, {pipeline_mode = #tpu.pipeline_mode<synchronous>, transform_indices = @transform_2, window_bounds = array<i64: 16, 8>}, {pipeline_mode = #tpu.pipeline_mode<synchronous>, transform_indices = @transform_3, window_bounds = array<i64: 16, 1>}, {pipeline_mode = #tpu.pipeline_mode<synchronous>, transform_indices = @transform_4, window_bounds = array<i64: 8, 16>}, {pipeline_mode = #tpu.pipeline_mode<synchronous>, transform_indices = @transform_5, window_bounds = array<i64: 8, 1>}, {pipeline_mode = #tpu.pipeline_mode<synchronous>, transform_indices = @transform_6, window_bounds = array<i64: 8, 16>}, {pipeline_mode = #tpu.pipeline_mode<synchronous>, transform_indices = @transform_7, window_bounds = array<i64: 8, 1>}, {pipeline_mode = #tpu.pipeline_mode<synchronous>, transform_indices = @transform_8, window_bounds = array<i64: 16, 256>}, {pipeline_mode = #tpu.pipeline_mode<synchronous>, transform_indices = @transform_9, window_bounds = array<i64: 16, 256>}, {transform_indices = @transform_10, window_bounds = array<i64: 8, 256>}]} {
    %c0 = arith.constant 0 : index
    %c0_0 = arith.constant 0 : index
    %0 = vector.load %arg1[%c0, %c0_0] : memref<8x256xf32, #tpu.memory_space<vmem>>, vector<8x256xf32>
    %c0_1 = arith.constant 0 : index
    %c0_2 = arith.constant 0 : index
    %1 = vector.load %arg2[%c0_1, %c0_2] : memref<256x32xf32, #tpu.memory_space<vmem>>, vector<256x32xf32>
    %cst = arith.constant dense<0.000000e+00> : vector<8x32xf32>
    %2 = tpu.matmul %0, %1, %cst {dimension_numbers = #tpu.dot_dimension_numbers<[1], [0], [0], [1], [0, 0, 1, 1], [], []>} : vector<8x256xf32>, vector<256x32xf32>, vector<8x32xf32> -> vector<8x32xf32>
    %c0_3 = arith.constant 0 : index
    %c0_4 = arith.constant 0 : index
    %3 = vector.load %arg3[%c0_3, %c0_4] : memref<16x8xf32, #tpu.memory_space<vmem>>, vector<16x8xf32>
    %cst_5 = arith.constant dense<0.000000e+00> : vector<16x32xf32>
    %4 = tpu.matmul %3, %2, %cst_5 {dimension_numbers = #tpu.dot_dimension_numbers<[1], [0], [0], [1], [0, 0, 1, 1], [], []>} : vector<16x8xf32>, vector<8x32xf32>, vector<16x32xf32> -> vector<16x32xf32>
    %c0_6 = arith.constant 0 : index
    %c0_7 = arith.constant 0 : index
    %5 = vector.load %arg4[%c0_6, %c0_7] : memref<16x1xf32, #tpu.memory_space<vmem>>, vector<16x1xf32>
    %6 = vector.broadcast %5 : vector<16x1xf32> to vector<16x32xf32>
    %7 = arith.addf %4, %6 : vector<16x32xf32>
    %cst_8 = arith.constant 3.000000e+00 : f32
    %8 = vector.broadcast %cst_8 : f32 to vector<16x32xf32>
    %9 = arith.addf %7, %8 : vector<16x32xf32>
    %cst_9 = arith.constant 0.000000e+00 : f32
    %cst_10 = arith.constant 6.000000e+00 : f32
    %10 = vector.broadcast %cst_9 : f32 to vector<16x32xf32>
    %11 = arith.maximumf %10, %9 : vector<16x32xf32>
    %12 = vector.broadcast %cst_10 : f32 to vector<16x32xf32>
    %13 = arith.minimumf %12, %11 : vector<16x32xf32>
    %cst_11 = arith.constant 0.166666672 : f32
    %14 = vector.broadcast %cst_11 : f32 to vector<16x32xf32>
    %15 = arith.mulf %13, %14 : vector<16x32xf32>
    %16 = arith.mulf %7, %15 : vector<16x32xf32>
    %c0_12 = arith.constant 0 : index
    %c0_13 = arith.constant 0 : index
    %17 = vector.load %arg5[%c0_12, %c0_13] : memref<8x16xf32, #tpu.memory_space<vmem>>, vector<8x16xf32>
    %18 = vector.extract_strided_slice %16 {offsets = [0, 0], sizes = [16, 16], strides = [1, 1]} : vector<16x32xf32> to vector<16x16xf32>
    %cst_14 = arith.constant dense<0.000000e+00> : vector<8x16xf32>
    %19 = tpu.matmul %17, %18, %cst_14 {dimension_numbers = #tpu.dot_dimension_numbers<[1], [0], [0], [1], [0, 0, 1, 1], [], []>} : vector<8x16xf32>, vector<16x16xf32>, vector<8x16xf32> -> vector<8x16xf32>
    %c0_15 = arith.constant 0 : index
    %c0_16 = arith.constant 0 : index
    %20 = vector.load %arg6[%c0_15, %c0_16] : memref<8x1xf32, #tpu.memory_space<vmem>>, vector<8x1xf32>
    %21 = vector.broadcast %20 : vector<8x1xf32> to vector<8x16xf32>
    %22 = arith.addf %19, %21 : vector<8x16xf32>
    %23 = arith.negf %22 : vector<8x16xf32>
    %24 = math.exp %23 : vector<8x16xf32>
    %cst_17 = arith.constant 1.000000e+00 : f32
    %25 = vector.broadcast %cst_17 : f32 to vector<8x16xf32>
    %26 = arith.addf %25, %24 : vector<8x16xf32>
    %27 = arith.divf %25, %26 : vector<8x16xf32>
    %c0_18 = arith.constant 0 : index
    %c0_19 = arith.constant 0 : index
    %28 = vector.load %arg7[%c0_18, %c0_19] : memref<8x16xf32, #tpu.memory_space<vmem>>, vector<8x16xf32>
    %29 = vector.extract_strided_slice %16 {offsets = [0, 16], sizes = [16, 16], strides = [1, 1]} : vector<16x32xf32> to vector<16x16xf32>
    %cst_20 = arith.constant dense<0.000000e+00> : vector<8x16xf32>
    %30 = tpu.matmul %28, %29, %cst_20 {dimension_numbers = #tpu.dot_dimension_numbers<[1], [0], [0], [1], [0, 0, 1, 1], [], []>} : vector<8x16xf32>, vector<16x16xf32>, vector<8x16xf32> -> vector<8x16xf32>
    %c0_21 = arith.constant 0 : index
    %c0_22 = arith.constant 0 : index
    %31 = vector.load %arg8[%c0_21, %c0_22] : memref<8x1xf32, #tpu.memory_space<vmem>>, vector<8x1xf32>
    %32 = vector.broadcast %31 : vector<8x1xf32> to vector<8x16xf32>
    %33 = arith.addf %30, %32 : vector<8x16xf32>
    %34 = arith.negf %33 : vector<8x16xf32>
    %35 = math.exp %34 : vector<8x16xf32>
    %cst_23 = arith.constant 1.000000e+00 : f32
    %36 = vector.broadcast %cst_23 : f32 to vector<8x16xf32>
    %37 = arith.addf %36, %35 : vector<8x16xf32>
    %38 = arith.divf %36, %37 : vector<8x16xf32>
    %c0_24 = arith.constant 0 : index
    %c0_25 = arith.constant 0 : index
    %39 = vector.load %arg9[%c0_24, %c0_25] : memref<16x256xf32, #tpu.memory_space<vmem>>, vector<16x256xf32>
    %cst_26 = arith.constant dense<0.000000e+00> : vector<8x256xf32>
    %40 = tpu.matmul %27, %39, %cst_26 {dimension_numbers = #tpu.dot_dimension_numbers<[1], [0], [0], [1], [0, 0, 1, 1], [], []>} : vector<8x16xf32>, vector<16x256xf32>, vector<8x256xf32> -> vector<8x256xf32>
    %c0_27 = arith.constant 0 : index
    %c0_28 = arith.constant 0 : index
    %41 = vector.load %arg10[%c0_27, %c0_28] : memref<16x256xf32, #tpu.memory_space<vmem>>, vector<16x256xf32>
    %cst_29 = arith.constant dense<0.000000e+00> : vector<8x256xf32>
    %42 = tpu.matmul %38, %41, %cst_29 {dimension_numbers = #tpu.dot_dimension_numbers<[1], [0], [0], [1], [0, 0, 1, 1], [], []>} : vector<8x16xf32>, vector<16x256xf32>, vector<8x256xf32> -> vector<8x256xf32>
    %43 = arith.mulf %0, %40 : vector<8x256xf32>
    %44 = arith.mulf %43, %42 : vector<8x256xf32>
    %c0_30 = arith.constant 0 : index
    %c0_31 = arith.constant 0 : index
    %45 = vector.load %arg11[%c0_30, %c0_31] : memref<8x256xf32, #tpu.memory_space<vmem>>, vector<8x256xf32>
    tpu.vector_store %arg11[%c0_30, %c0_31], %44 {strides = array<i32>} : memref<8x256xf32, #tpu.memory_space<vmem>>, vector<8x256xf32>,
    return
  }
  func.func @transform_0(%arg0: i32) -> (i32, i32) {
    %c0_i32 = arith.constant 0 : i32
    %c0_i32_0 = arith.constant 0 : i32
    return %arg0, %c0_i32 : i32, i32
  }
  func.func @transform_1(%arg0: i32) -> (i32, i32) {
    %c0_i32 = arith.constant 0 : i32
    %c0_i32_0 = arith.constant 0 : i32
    %c0_i32_1 = arith.constant 0 : i32
    return %c0_i32, %c0_i32_0 : i32, i32
  }
  func.func @transform_2(%arg0: i32) -> (i32, i32) {
    %c0_i32 = arith.constant 0 : i32
    %c0_i32_0 = arith.constant 0 : i32
    %c0_i32_1 = arith.constant 0 : i32
    return %c0_i32, %c0_i32_0 : i32, i32
  }
  func.func @transform_3(%arg0: i32) -> (i32, i32) {
    %c0_i32 = arith.constant 0 : i32
    %c0_i32_0 = arith.constant 0 : i32
    %c0_i32_1 = arith.constant 0 : i32
    return %c0_i32, %c0_i32_0 : i32, i32
  }
  func.func @transform_4(%arg0: i32) -> (i32, i32) {
    %c0_i32 = arith.constant 0 : i32
    %c0_i32_0 = arith.constant 0 : i32
    %c0_i32_1 = arith.constant 0 : i32
    return %c0_i32, %c0_i32_0 : i32, i32
  }
  func.func @transform_5(%arg0: i32) -> (i32, i32) {
    %c0_i32 = arith.constant 0 : i32
    %c0_i32_0 = arith.constant 0 : i32
    %c0_i32_1 = arith.constant 0 : i32
    return %c0_i32, %c0_i32_0 : i32, i32
  }
  func.func @transform_6(%arg0: i32) -> (i32, i32) {
    %c0_i32 = arith.constant 0 : i32
    %c0_i32_0 = arith.constant 0 : i32
    %c0_i32_1 = arith.constant 0 : i32
    return %c0_i32, %c0_i32_0 : i32, i32
  }
  func.func @transform_7(%arg0: i32) -> (i32, i32) {
    %c0_i32 = arith.constant 0 : i32
    %c0_i32_0 = arith.constant 0 : i32
    %c0_i32_1 = arith.constant 0 : i32
    return %c0_i32, %c0_i32_0 : i32, i32
  }
  func.func @transform_8(%arg0: i32) -> (i32, i32) {
    %c0_i32 = arith.constant 0 : i32
    %c0_i32_0 = arith.constant 0 : i32
    %c0_i32_1 = arith.constant 0 : i32
    return %c0_i32, %c0_i32_0 : i32, i32
  }
  func.func @transform_9(%arg0: i32) -> (i32, i32) {
    %c0_i32 = arith.constant 0 : i32
    %c0_i32_0 = arith.constant 0 : i32
    %c0_i32_1 = arith.constant 0 : i32
    return %c0_i32, %c0_i32_0 : i32, i32
  }
  func.func @transform_10(%arg0: i32) -> (i32, i32) {
    %c0_i32 = arith.constant 0 : i32
    %c0_i32_0 = arith.constant 0 : i32
    return %arg0, %c0_i32 : i32, i32
  }
}

module attributes {stable_mosaic.version = 11 : i64} {
  func.func @_coordatt_kernel(%arg0: i32, %arg1: memref<8x256xf32, #tpu.memory_space<vmem>>, %arg2: memref<256x32xf32, #tpu.memory_space<vmem>>, %arg3: memref<16x8xf32, #tpu.memory_space<vmem>>, %arg4: memref<16x1xf32, #tpu.memory_space<vmem>>, %arg5: memref<8x16xf32, #tpu.memory_space<vmem>>, %arg6: memref<8x1xf32, #tpu.memory_space<vmem>>, %arg7: memref<8x16xf32, #tpu.memory_space<vmem>>, %arg8: memref<8x1xf32, #tpu.memory_space<vmem>>, %arg9: memref<16x256xf32, #tpu.memory_space<vmem>>, %arg10: memref<16x256xf32, #tpu.memory_space<vmem>>, %arg11: memref<8x256xf32, #tpu.memory_space<vmem>>) attributes {dimension_semantics = [#tpu.dimension_semantics<parallel>], iteration_bounds = array<i64: 1>, scalar_prefetch = 0 : i64, scratch_operands = 0 : i64, tpu.core_type = #tpu.core_type<tc>, window_params = [{transform_indices = @transform_0, window_bounds = array<i64: 8, 256>}, {pipeline_mode = #tpu.pipeline_mode<synchronous>, transform_indices = @transform_1, window_bounds = array<i64: 256, 32>}, {pipeline_mode = #tpu.pipeline_mode<synchronous>, transform_indices = @transform_2, window_bounds = array<i64: 16, 8>}, {pipeline_mode = #tpu.pipeline_mode<synchronous>, transform_indices = @transform_3, window_bounds = array<i64: 16, 1>}, {pipeline_mode = #tpu.pipeline_mode<synchronous>, transform_indices = @transform_4, window_bounds = array<i64: 8, 16>}, {pipeline_mode = #tpu.pipeline_mode<synchronous>, transform_indices = @transform_5, window_bounds = array<i64: 8, 1>}, {pipeline_mode = #tpu.pipeline_mode<synchronous>, transform_indices = @transform_6, window_bounds = array<i64: 8, 16>}, {pipeline_mode = #tpu.pipeline_mode<synchronous>, transform_indices = @transform_7, window_bounds = array<i64: 8, 1>}, {pipeline_mode = #tpu.pipeline_mode<synchronous>, transform_indices = @transform_8, window_bounds = array<i64: 16, 256>}, {pipeline_mode = #tpu.pipeline_mode<synchronous>, transform_indices = @transform_9, window_bounds = array<i64: 16, 256>}, {transform_indices = @transform_10, window_bounds = array<i64: 8, 256>}]} {
    %c0 = arith.constant 0 : index
    %c0_0 = arith.constant 0 : index
    %0 = vector.load %arg1[%c0, %c0_0] : memref<8x256xf32, #tpu.memory_space<vmem>>, vector<8x256xf32>
    %c0_1 = arith.constant 0 : index
    %c0_2 = arith.constant 0 : index
    %1 = vector.load %arg2[%c0_1, %c0_2] : memref<256x32xf32, #tpu.memory_space<vmem>>, vector<256x32xf32>
    %cst = arith.constant dense<0.000000e+00> : vector<8x32xf32>
    %2 = tpu.matmul %0, %1, %cst {dimension_numbers = #tpu.dot_dimension_numbers<[1], [0], [0], [1], [0, 0, 1, 1], [], []>} : vector<8x256xf32>, vector<256x32xf32>, vector<8x32xf32> -> vector<8x32xf32>
    %c0_3 = arith.constant 0 : index
    %c0_4 = arith.constant 0 : index
    %3 = vector.load %arg3[%c0_3, %c0_4] : memref<16x8xf32, #tpu.memory_space<vmem>>, vector<16x8xf32>
    %cst_5 = arith.constant dense<0.000000e+00> : vector<16x32xf32>
    %4 = tpu.matmul %3, %2, %cst_5 {dimension_numbers = #tpu.dot_dimension_numbers<[1], [0], [0], [1], [0, 0, 1, 1], [], []>} : vector<16x8xf32>, vector<8x32xf32>, vector<16x32xf32> -> vector<16x32xf32>
    %c0_6 = arith.constant 0 : index
    %c0_7 = arith.constant 0 : index
    %5 = vector.load %arg4[%c0_6, %c0_7] : memref<16x1xf32, #tpu.memory_space<vmem>>, vector<16x1xf32>
    %6 = vector.broadcast %5 : vector<16x1xf32> to vector<16x32xf32>
    %7 = arith.addf %4, %6 : vector<16x32xf32>
    %cst_8 = arith.constant 3.000000e+00 : f32
    %8 = vector.broadcast %cst_8 : f32 to vector<16x32xf32>
    %9 = arith.addf %7, %8 : vector<16x32xf32>
    %cst_9 = arith.constant 0.000000e+00 : f32
    %cst_10 = arith.constant 6.000000e+00 : f32
    %10 = vector.broadcast %cst_9 : f32 to vector<16x32xf32>
    %11 = arith.maximumf %10, %9 : vector<16x32xf32>
    %12 = vector.broadcast %cst_10 : f32 to vector<16x32xf32>
    %13 = arith.minimumf %12, %11 : vector<16x32xf32>
    %cst_11 = arith.constant 0.166666672 : f32
    %14 = vector.broadcast %cst_11 : f32 to vector<16x32xf32>
    %15 = arith.mulf %13, %14 : vector<16x32xf32>
    %16 = arith.mulf %7, %15 : vector<16x32xf32>
    %c0_12 = arith.constant 0 : index
    %c0_13 = arith.constant 0 : index
    %17 = vector.load %arg5[%c0_12, %c0_13] : memref<8x16xf32, #tpu.memory_space<vmem>>, vector<8x16xf32>
    %18 = vector.extract_strided_slice %16 {offsets = [0, 0], sizes = [16, 16], strides = [1, 1]} : vector<16x32xf32> to vector<16x16xf32>
    %cst_14 = arith.constant dense<0.000000e+00> : vector<8x16xf32>
    %19 = tpu.matmul %17, %18, %cst_14 {dimension_numbers = #tpu.dot_dimension_numbers<[1], [0], [0], [1], [0, 0, 1, 1], [], []>} : vector<8x16xf32>, vector<16x16xf32>, vector<8x16xf32> -> vector<8x16xf32>
    %c0_15 = arith.constant 0 : index
    %c0_16 = arith.constant 0 : index
    %20 = vector.load %arg6[%c0_15, %c0_16] : memref<8x1xf32, #tpu.memory_space<vmem>>, vector<8x1xf32>
    %21 = vector.broadcast %20 : vector<8x1xf32> to vector<8x16xf32>
    %22 = arith.addf %19, %21 : vector<8x16xf32>
    %23 = arith.negf %22 : vector<8x16xf32>
    %24 = math.exp %23 : vector<8x16xf32>
    %cst_17 = arith.constant 1.000000e+00 : f32
    %25 = vector.broadcast %cst_17 : f32 to vector<8x16xf32>
    %26 = arith.addf %25, %24 : vector<8x16xf32>
    %27 = arith.divf %25, %26 : vector<8x16xf32>
    %c0_18 = arith.constant 0 : index
    %c0_19 = arith.constant 0 : index
    %28 = vector.load %arg7[%c0_18, %c0_19] : memref<8x16xf32, #tpu.memory_space<vmem>>, vector<8x16xf32>
    %29 = vector.extract_strided_slice %16 {offsets = [0, 16], sizes = [16, 16], strides = [1, 1]} : vector<16x32xf32> to vector<16x16xf32>
    %cst_20 = arith.constant dense<0.000000e+00> : vector<8x16xf32>
    %30 = tpu.matmul %28, %29, %cst_20 {dimension_numbers = #tpu.dot_dimension_numbers<[1], [0], [0], [1], [0, 0, 1, 1], [], []>} : vector<8x16xf32>, vector<16x16xf32>, vector<8x16xf32> -> vector<8x16xf32>
    %c0_21 = arith.constant 0 : index
    %c0_22 = arith.constant 0 : index
    %31 = vector.load %arg8[%c0_21, %c0_22] : memref<8x1xf32, #tpu.memory_space<vmem>>, vector<8x1xf32>
    %32 = vector.broadcast %31 : vector<8x1xf32> to vector<8x16xf32>
    %33 = arith.addf %30, %32 : vector<8x16xf32>
    %34 = arith.negf %33 : vector<8x16xf32>
    %35 = math.exp %34 : vector<8x16xf32>
    %cst_23 = arith.constant 1.000000e+00 : f32
    %36 = vector.broadcast %cst_23 : f32 to vector<8x16xf32>
    %37 = arith.addf %36, %35 : vector<8x16xf32>
    %38 = arith.divf %36, %37 : vector<8x16xf32>
    %c0_24 = arith.constant 0 : index
    %c0_25 = arith.constant 0 : index
    %39 = vector.load %arg9[%c0_24, %c0_25] : memref<16x256xf32, #tpu.memory_space<vmem>>, vector<16x256xf32>
    %cst_26 = arith.constant dense<0.000000e+00> : vector<8x256xf32>
    %40 = tpu.matmul %27, %39, %cst_26 {dimension_numbers = #tpu.dot_dimension_numbers<[1], [0], [0], [1], [0, 0, 1, 1], [], []>} : vector<8x16xf32>, vector<16x256xf32>, vector<8x256xf32> -> vector<8x256xf32>
    %c0_27 = arith.constant 0 : index
    %c0_28 = arith.constant 0 : index
    %41 = vector.load %arg10[%c0_27, %c0_28] : memref<16x256xf32, #tpu.memory_space<vmem>>, vector<16x256xf32>
    %cst_29 = arith.constant dense<0.000000e+00> : vector<8x256xf32>
    %42 = tpu.matmul %38, %41, %cst_29 {dimension_numbers = #tpu.dot_dimension_numbers<[1], [0], [0], [1], [0, 0, 1, 1], [], []>} : vector<8x16xf32>, vector<16x256xf32>, vector<8x256xf32> -> vector<8x256xf32>
    %43 = arith.mulf %0, %40 : vector<8x256xf32>
    %44 = arith.mulf %43, %42 : vector<8x256xf32>
    %c0_30 = arith.constant 0 : index
    %c0_31 = arith.constant 0 : index
    %45 = vector.load %arg11[%c0_30, %c0_31] : memref<8x256xf32, #tpu.memory_space<vmem>>, vector<8x256xf32>
    tpu.vector_store %arg11[%c0_30, %c0_31], %44 {strides = array<i32>} : memref<8x256xf32, #tpu.memory_space<vmem>>, vector<8x256xf32>,
    return
  }
  func.func @transform_0(%arg0: i32) -> (i32, i32) {
    %c0_i32 = arith.constant 0 : i32
    %c0_i32_0 = arith.constant 0 : i32
    return %arg0, %c0_i32 : i32, i32
  }
  func.func @transform_1(%arg0: i32) -> (i32, i32) {
    %c0_i32 = arith.constant 0 : i32
    %c0_i32_0 = arith.constant 0 : i32
    %c0_i32_1 = arith.constant 0 : i32
    return %c0_i32, %c0_i32_0 : i32, i32
  }
  func.func @transform_2(%arg0: i32) -> (i32, i32) {
    %c0_i32 = arith.constant 0 : i32
    %c0_i32_0 = arith.constant 0 : i32
    %c0_i32_1 = arith.constant 0 : i32
    return %c0_i32, %c0_i32_0 : i32, i32
  }
  func.func @transform_3(%arg0: i32) -> (i32, i32) {
    %c0_i32 = arith.constant 0 : i32
    %c0_i32_0 = arith.constant 0 : i32
    %c0_i32_1 = arith.constant 0 : i32
    return %c0_i32, %c0_i32_0 : i32, i32
  }
  func.func @transform_4(%arg0: i32) -> (i32, i32) {
    %c0_i32 = arith.constant 0 : i32
    %c0_i32_0 = arith.constant 0 : i32
    %c0_i32_1 = arith.constant 0 : i32
    return %c0_i32, %c0_i32_0 : i32, i32
  }
  func.func @transform_5(%arg0: i32) -> (i32, i32) {
    %c0_i32 = arith.constant 0 : i32
    %c0_i32_0 = arith.constant 0 : i32
    %c0_i32_1 = arith.constant 0 : i32
    return %c0_i32, %c0_i32_0 : i32, i32
  }
  func.func @transform_6(%arg0: i32) -> (i32, i32) {
    %c0_i32 = arith.constant 0 : i32
    %c0_i32_0 = arith.constant 0 : i32
    %c0_i32_1 = arith.constant 0 : i32
    return %c0_i32, %c0_i32_0 : i32, i32
  }
  func.func @transform_7(%arg0: i32) -> (i32, i32) {
    %c0_i32 = arith.constant 0 : i32
    %c0_i32_0 = arith.constant 0 : i32
    %c0_i32_1 = arith.constant 0 : i32
    return %c0_i32, %c0_i32_0 : i32, i32
  }
  func.func @transform_8(%arg0: i32) -> (i32, i32) {
    %c0_i32 = arith.constant 0 : i32
    %c0_i32_0 = arith.constant 0 : i32
    %c0_i32_1 = arith.constant 0 : i32
    return %c0_i32, %c0_i32_0 : i32, i32
  }
  func.func @transform_9(%arg0: i32) -> (i32, i32) {
    %c0_i32 = arith.constant 0 : i32
    %c0_i32_0 = arith.constant 0 : i32
    %c0_i32_1 = arith.constant 0 : i32
    return %c0_i32, %c0_i32_0 : i32, i32
  }
  func.func @transform_10(%arg0: i32) -> (i32, i32) {
    %c0_i32 = arith.constant 0 : i32
    %c0_i32_0 = arith.constant 0 : i32
    return %arg0, %c0_i32 : i32, i32
  }
}

</mosaic_0001>

<bundles_post_ra>
// kernel: tpu_custom_call.1
= control target key start
LH: loop header
LB: loop body
LE: loop exit
PB: predicated region body
PF: predicated region fallthrough
CT: control target
= control target key end

     0   :  { %s948_s0 = inlined_call_operand.vmem [shape: f32[8,256], index: 0, kind: input, shape index: {}]   ;;  %s949_s1 = inlined_call_operand.vmem [shape: f32[256,32], index: 1, kind: input, shape index: {}]   ;;  %s950_s2 = inlined_call_operand.vmem [shape: f32[16,8], index: 2, kind: input, shape index: {}]   ;;  %s951_s3 = inlined_call_operand.vmem [shape: f32[16,1], index: 3, kind: input, shape index: {}]   ;;  %s952_s4 = inlined_call_operand.vmem [shape: f32[8,16], index: 4, kind: input, shape index: {}]   ;;  %s953_s5 = inlined_call_operand.vmem [shape: f32[8,1], index: 5, kind: input, shape index: {}]   ;;  %s954_s6 = inlined_call_operand.vmem [shape: f32[8,16], index: 6, kind: input, shape index: {}]   ;;  %s955_s7 = inlined_call_operand.vmem [shape: f32[8,1], index: 7, kind: input, shape index: {}]   ;;  %s956_s8 = inlined_call_operand.vmem [shape: f32[16,256], index: 8, kind: input, shape index: {}]   ;;  %s957_s9 = inlined_call_operand.vmem [shape: f32[16,256], index: 9, kind: input, shape index: {}]   ;;  %s958_s10 = inlined_call_operand.hbm [shape: f32[8,256], index: 10, kind: output, shape index: {}]  }
   0x1   :  { %v69_v0 = vld [vmem:[%s949_s1 + $0xf8] sm:$0xff]  ;;  %v68_v2 = vld [vmem:[%s949_s1 + $0xf0] sm:$0xff]  ;;  %v67_v4 = vld [vmem:[%s949_s1 + $0xe8] sm:$0xff] }
   0x2   :  { %v53_v1 = vld [vmem:[%s949_s1 + $0x78] sm:$0xff]  ;;  %611 = vmatprep.subr.mxu0 %v69_v0  ;;  %v52_v3 = vld [vmem:[%s949_s1 + $0x70] sm:$0xff]  ;;  %v51_v5 = vld [vmem:[%s949_s1 + $0x68] sm:$0xff] }
   0x3   :  { %612 = vmatpush3.msra.mxu0 %v53_v1  ;;  %v66_v6 = vld [vmem:[%s949_s1 + $0xe0] sm:$0xff]  ;;  %v65_v8 = vld [vmem:[%s949_s1 + $0xd8] sm:$0xff]  ;;  %v64_v10 = vld [vmem:[%s949_s1 + $0xd0] sm:$0xff] }
   0x4   :  { %613 = vmatprep.subr.mxu0 %v68_v2  ;;  %v50_v7 = vld [vmem:[%s949_s1 + $0x60] sm:$0xff]  ;;  %v49_v9 = vld [vmem:[%s949_s1 + $0x58] sm:$0xff]  ;;  %v48_v11 = vld [vmem:[%s949_s1 + $0x50] sm:$0xff] }
   0x5   :  { %614 = vmatpush3.msra.mxu0 %v52_v3  ;;  %v63_v12 = vld [vmem:[%s949_s1 + $0xc8] sm:$0xff] }
   0x6   :  { %615 = vmatprep.subr.mxu0 %v67_v4  ;;  %v813_v13 = vld [vmem:[%s948_s0 + $0x8] sm:$0xff] }
   0x7   :  { %616 = vmatpush3.msra.mxu0 %v51_v5  ;;  %v47_v14 = vld [vmem:[%s949_s1 + $0x48] sm:$0xff]  ;;  %134 = vmatprep.mubr.f32.mxu0 %v813_v13 }
   0x8   :  { %617 = vmatprep.subr.mxu0 %v66_v6 }
   0x9   :  { %618 = vmatpush3.msra.mxu0 %v50_v7 }
   0xa   :  { %619 = vmatprep.subr.mxu0 %v65_v8 }
   0xb   :  { %620 = vmatpush3.msra.mxu0 %v49_v9 }
   0xc   :  { %621 = vmatprep.subr.mxu0 %v64_v10 }
   0xd   :  { %15 = vsyncpa [#allocation3], 0  ;;  %622 = vmatpush3.msra.mxu0 %v48_v11  ;;  %v62_v15 = vld [vmem:[%s949_s1 + $0xc0] sm:$0xff]  ;;  %v61_v17 = vld [vmem:[%s949_s1 + $0xb8] sm:$0xff]  ;;  %vm154_vm0 = vcmask 64512   ;;  %v711_v36 = vmov 0  }
   0xe   :  { %623 = vmatprep.subr.mxu0 %v63_v12  ;;  %v46_v16 = vld [vmem:[%s949_s1 + $0x40] sm:$0xff]  ;;  %v45_v18 = vld [vmem:[%s949_s1 + $0x38] sm:$0xff]  ;;  %v60_v19 = vld [vmem:[%s949_s1 + $0xb0] sm:$0xff]  ;;  %679 = vset.pattern.permute.xlu0 %v711_v36  ;;  %v712_v43 = vmov 0.0   ;;  %vm713_vm1 = vmmov 0   ;;  %vm253_vm2 = vcmask 130048  }
   0xf   :  { %624 = vmatpush3.msra.mxu0 %v47_v14  ;;  %v44_v20 = vld [vmem:[%s949_s1 + $0x30] sm:$0xff]  ;;  %v59_v21 = vld [vmem:[%s949_s1 + $0xa8] sm:$0xff]  ;;  %v58_v23 = vld [vmem:[%s949_s1 + $0xa0] sm:$0xff]  ;;  %680 = vset.pattern.permute.xlu1 %v711_v36 }
  0x10   :  { %625 = vmatprep.subr.mxu0 %v62_v15  ;;  %v43_v22 = vld [vmem:[%s949_s1 + $0x28] sm:$0xff]  ;;  %v42_v24 = vld [vmem:[%s949_s1 + $0x20] sm:$0xff]  ;;  %v57_v25 = vld [vmem:[%s949_s1 + $0x98] sm:$0xff] }
  0x11   :  { %626 = vmatpush3.msra.mxu0 %v46_v16  ;;  %v41_v26 = vld [vmem:[%s949_s1 + $0x18] sm:$0xff]  ;;  %v56_v27 = vld [vmem:[%s949_s1 + $0x90] sm:$0xff]  ;;  %v55_v29 = vld [vmem:[%s949_s1 + $0x88] sm:$0xff] }
  0x12   :  { %627 = vmatprep.subr.mxu0 %v61_v17  ;;  %v40_v28 = vld [vmem:[%s949_s1 + $0x10] sm:$0xff]  ;;  %v39_v30 = vld [vmem:[%s949_s1 + $0x8] sm:$0xff]  ;;  %v54_v31 = vld [vmem:[%s949_s1 + $0x80] sm:$0xff] }
  0x13   :  { %628 = vmatpush3.msra.mxu0 %v45_v18  ;;  %v38_v32 = vld [vmem:[%s949_s1] sm:$0xff]  ;;  %v143_v35 = vld [vmem:[%s951_s3 + $0x8] sm:$0xff]  ;;  %v430_v0 = vld [vmem:[%s956_s8 + $0x18] sm:$0xff] }
  0x14   :  { %629 = vmatprep.subr.mxu0 %v60_v19  ;;  %v876_v33 = vld [vmem:[%s948_s0] sm:$0xff]  ;;  %151 = vperm.xlu0 %679, %v143_v35   ;;  %v141_v42 = vld [vmem:[%s950_s2 + $0x8] sm:$0xff]  ;;  %v429_v2 = vld [vmem:[%s956_s8 + $0x10] sm:$0xff] }
  0x15   :  { %630 = vmatpush3.msra.mxu0 %v44_v20  ;;  %v140_v34 = vld [vmem:[%s950_s2] sm:$0xff]  ;;  %s714_s2 = smov 112   ;;  %v428_v3 = vld [vmem:[%s956_s8 + $0x8] sm:$0xff]  ;;  %v508_v10 = vld [vmem:[%s957_s9 + $0x18] sm:$0xff] }
  0x16   :  { %631 = vmatprep.subr.mxu0 %v59_v21  ;;  %657 = vmatprep.mubr.msk.f32.mxu1 %vm154_vm0, %v140_v34  ;;  %v142_v37 = vld [vmem:[%s951_s3] sm:$0xff]  ;;  %v507_v14 = vld [vmem:[%s957_s9 + $0x10] sm:$0xff]  ;;  %v506_v16 = vld [vmem:[%s957_s9 + $0x8] sm:$0xff] }
  0x17   :  { %632 = vmatpush3.msra.mxu0 %v43_v22  ;;  %v247_v38 = vld [vmem:[%s953_s5] sm:$0xff] }
  0x18   :  { %633 = vmatprep.subr.mxu0 %v58_v23  ;;  %146 = vperm.xlu0 %679, %v142_v37   ;;  %v246_v60 = vld [vmem:[%s952_s4] sm:$0xff] }
  0x19   :  { %634 = vmatpush3.msra.mxu0 %v42_v24  ;;  %v334_v61 = vld [vmem:[%s955_s7] sm:$0xff] }
  0x1a   :  { %635 = vmatprep.subr.mxu0 %v57_v25  ;;  %v333_v63 = vld [vmem:[%s954_s6] sm:$0xff] }
  0x1b   :  { %636 = vmatpush3.msra.mxu0 %v41_v26  ;;  %v427_v4 = vld [vmem:[%s956_s8] sm:$0xff] }
  0x1c   :  { %637 = vmatprep.subr.mxu0 %v56_v27  ;;  %250 = vperm.xlu0 %679, %v247_v38   ;;  %v505_v17 = vld [vmem:[%s957_s9] sm:$0xff]  ;;  %s715_s9 = smov [#allocation2]  }
  0x1d   :  { %638 = vmatpush3.msra.mxu0 %v40_v28  ;;  %s595_s0 = sshll.u32 %s715_s9, 4  ;;  %s596_s0 = int_to_ptr.vmem [resolvable:$true] %s595_s0 }
  0x1e   :  { %639 = vmatprep.subr.mxu0 %v55_v29  ;;  %s689_s1 = scalar_lea.vmem %s596_s0, 256  ;;  %p694_p1 = scmp.lt.s32.totalorder %s596_s0, %s596_s0 }
  0x1f   :  { %640 = vmatpush3.msra.mxu0 %v39_v30  ;;  %p690_p0 = scmp.ne.s32.totalorder %s596_s0, %s689_s1  ;;  %p695_p2 = scmp.lt.s32.totalorder %s689_s1, %s689_s1 }
  0x20   :  { %641 = vmatprep.subr.mxu0 %v54_v31 }
  0x21   :  { %642 = vmatpush3.msra.mxu0 %v38_v32  ;;  %p696_p3 = por %p695_p2, %p694_p1 }
  0x22   :  { %135 = vmatmul.mubr.f32.vlgmr.msra.gmra.mxu0 %v876_v33 }
  0x23   :  { %p697_p4 = pnand %p696_p3, %p690_p0 }
  0x8f   :  { %v152_v44 = vpop.permute.xlu0 %151 }
  0x93   :  { %v147_v47 = vpop.permute.xlu0 %146 }
  0x97   :  { %v251_v5 = vpop.permute.xlu0 %250 }
  0xe2   :  { %v643_v39 = vpop.f32.mrf.mxu0 }
  0xe4   :  { %v644_v40 = vpop.f32.mrf.mxu0 }
  0xe5   :  { %v645_v41 = vadd.f32 %v644_v40, %v643_v39 }
  0xe7   :  { %655 = vmatprep.subr.mxu1 %v645_v41 }
  0xe8   :  { %656 = vmatpush3.msra.mxu1 %v645_v41 }
  0xe9   :  { %658 = vmatmul.mubr.msk.f32.vlgmr.msra.gmra.mxu1 %vm154_vm0, %v141_v42  ;;  %660 = vmatprep.subr.mxu1 %v712_v43 }
  0xea   :  { %664 = vmatprep.mubr.msk.f32.mxu1 %vm713_vm1, %v712_v43 }
 0x1a9   :  { %v659_v45 = vpop.f32.mrf.mxu1 }
 0x1aa   :  { %v233_v46 = vadd.f32 %v659_v45, %v152_v44 }
 0x1ab   :  { %v227_v48 = vpop.f32.mrf.mxu1 }
 0x1ac   :  { %v237_v49 = vadd.f32 3.0, %v233_v46  ;;  %v228_v50 = vadd.f32 %v227_v48, %v147_v47 }
 0x1ae   :  { %v239_v51 = vmax.f32 %v237_v49, 0.0  ;;  %v236_v52 = vadd.f32 3.0, %v228_v50 }
 0x1b0   :  { %v241_v53 = vmin.f32 %v239_v51, 6.0  ;;  %v238_v54 = vmax.f32 %v236_v52, 0.0 }
 0x1b2   :  { %v240_v55 = vmin.f32 %v238_v54, 6.0  ;;  %v243_v56 = vmul.f32 0.16666667, %v241_v53 }
 0x1b4   :  { %v242_v57 = vmul.f32 0.16666667, %v240_v55  ;;  %v245_v58 = vmul.f32 %v243_v56, %v233_v46 }
 0x1b6   :  { %v244_v59 = vmul.f32 %v242_v57, %v228_v50  ;;  %344 = vrot.lane.b32.xlu1 %v245_v58, %s714_s2  ;;  %661 = vmatpush3.msra.mxu1 %v245_v58 }
 0x1b7   :  { %662 = vmatprep.subr.mxu1 %v712_v43 }
 0x1b8   :  { %663 = vmatpush3.msra.mxu1 %v244_v59 }
 0x1b9   :  { %665 = vmatmul.mubr.msk.f32.vlgmr.msra.gmra.mxu1 %vm253_vm2, %v246_v60  ;;  %667 = vmatprep.subr.mxu1 %v712_v43 }
 0x1ba   :  { %342 = vrot.lane.b32.xlu1 %v244_v59, %s714_s2  ;;  %671 = vmatprep.mubr.msk.f32.mxu1 %vm713_vm1, %v712_v43 }
 0x1be   :  { %337 = vperm.xlu1 %680, %v334_v61  }
 0x228   :  { %v345_v62 = vpop.permute.xlu1 %344 }
 0x229   :  { %668 = vmatpush3.msra.mxu1 %v345_v62 }
 0x22a   :  { %669 = vmatprep.subr.mxu1 %v712_v43 }
 0x22c   :  { %v343_v1 = vpop.permute.xlu1 %342 }
 0x22d   :  { %670 = vmatpush3.msra.mxu1 %v343_v1 }
 0x22e   :  { %672 = vmatmul.mubr.msk.f32.vlgmr.msra.gmra.mxu1 %vm253_vm2, %v333_v63  ;;  %462 = vmatprep.subr.mxu1 %v430_v0 }
 0x22f   :  { %463 = vmatpush1.msra.mxu1 %v429_v2  ;;  %498 = vmatprep.mubr.f32.mxu1 %v712_v43 }
 0x230   :  { %464 = vmatprep.subr.mxu1 %v428_v3 }
 0x231   :  { %465 = vmatpush1.msra.mxu1 %v427_v4 }
 0x232   :  { %540 = vmatprep.subr.mxu1 %v508_v10 }
 0x239   :  { %v338_v18 = vpop.permute.xlu1 %337 }
 0x279   :  { %v323_v6 = vpop.f32.mrf.mxu1 }
 0x27a   :  { %v324_v7 = vadd.f32 %v323_v6, %v251_v5 }
 0x27b   :  { %v666_v8 = vpop.f32.mrf.mxu1 }
 0x27c   :  { %v606_v9 = vmul.f32 -1.442695, %v324_v7 }
 0x27e   :  { %681 = vpow2.f32 %v606_v9 }
 0x28b   :  { %v682_v11 = vpop.eup %681 }
 0x28c   :  { %v330_v12 = vadd.f32 1.0, %v682_v11 }
 0x28e   :  { %683 = vrcp.f32 %v330_v12 }
 0x29b   :  { %v684_v15 = vpop.eup %683 }
 0x29c   :  { %609 = vmatmul.mubr.msk.f32.vlgmr.msra.gmra.mxu1 %vm253_vm2, %v684_v15 }
 0x29d   :  { %541 = vmatpush1.msra.mxu1 %v507_v14  ;;  %576 = vmatprep.mubr.f32.mxu1 %v712_v43 }
 0x29e   :  { %542 = vmatprep.subr.mxu1 %v506_v16 }
 0x29f   :  { %543 = vmatpush1.msra.mxu1 %v505_v17 }
 0x2ee   :  { %v417_v19 = vpop.f32.mrf.mxu1 }
 0x2ef   :  { %v418_v20 = vadd.f32 %v417_v19, %v338_v18 }
 0x2f0   :  { %v673_v21 = vpop.f32.mrf.mxu1 }
 0x2f1   :  { %v608_v22 = vmul.f32 -1.442695, %v418_v20 }
 0x2f3   :  { %685 = vpow2.f32 %v608_v22 }
 0x300   :  { %v686_v23 = vpop.eup %685 }
 0x301   :  { %v424_v24 = vadd.f32 1.0, %v686_v23 }
 0x303   :  { %687 = vrcp.f32 %v424_v24 }
 0x310   :  { %v688_v25 = vpop.eup %687 }
 0x311   :  { %610 = vmatmul.mubr.msk.f32.vlgmr.msra.gmra.mxu1 %vm253_vm2, %v688_v25 }
 0x35c   :  { %v500_v26 = vpop.f32.mrf.mxu1 }
 0x35d   :  { %v583_v28 = vmul.f32 %v500_v26, %v876_v33 }
 0x35e   :  { %v502_v27 = vpop.f32.mrf.mxu1 }
 0x35f   :  { %v584_v30 = vmul.f32 %v502_v27, %v813_v13 }
 0x3d1   :  { %v578_v29 = vpop.f32.mrf.mxu1 }
 0x3d2   :  { %v585_v31 = vmul.f32 %v583_v28, %v578_v29 }
 0x3d3   :  { %v580_v32 = vpop.f32.mrf.mxu1 }
 0x3d4   :  { %587 = vst [vmem:[#allocation2] sm:$0xff] %v585_v31  ;;  %v586_v34 = vmul.f32 %v584_v30, %v580_v32 }
 0x3d6   :  { %588 = vst [vmem:[#allocation2 + $0x8] sm:$0xff] %v586_v34 }
 0x3d7   :  { %700 = shalt.err (!%p697_p4)
}
 0x3d8   :  { %598 = dma.vmem_to_hbm [thread:$0]  %s596_s0, 256, %s958_s10, [#allocation3]  }
 0x3d9   :  { %709 = dma.done.wait [#allocation3], 256  }
 0x3da   :  { %710 = vsyncadd [#allocation3], 4294967040 }
 0x3db   :  { %602 = vsyncpa [#allocation3], 1 }

// kernel: tpu_custom_call.1
= control target key start
LH: loop header
LB: loop body
LE: loop exit
PB: predicated region body
PF: predicated region fallthrough
CT: control target
= control target key end

     0   :  { %s948_s0 = inlined_call_operand.vmem [shape: f32[8,256], index: 0, kind: input, shape index: {}]   ;;  %s949_s1 = inlined_call_operand.vmem [shape: f32[256,32], index: 1, kind: input, shape index: {}]   ;;  %s950_s2 = inlined_call_operand.vmem [shape: f32[16,8], index: 2, kind: input, shape index: {}]   ;;  %s951_s3 = inlined_call_operand.vmem [shape: f32[16,1], index: 3, kind: input, shape index: {}]   ;;  %s952_s4 = inlined_call_operand.vmem [shape: f32[8,16], index: 4, kind: input, shape index: {}]   ;;  %s953_s5 = inlined_call_operand.vmem [shape: f32[8,1], index: 5, kind: input, shape index: {}]   ;;  %s954_s6 = inlined_call_operand.vmem [shape: f32[8,16], index: 6, kind: input, shape index: {}]   ;;  %s955_s7 = inlined_call_operand.vmem [shape: f32[8,1], index: 7, kind: input, shape index: {}]   ;;  %s956_s8 = inlined_call_operand.vmem [shape: f32[16,256], index: 8, kind: input, shape index: {}]   ;;  %s957_s9 = inlined_call_operand.vmem [shape: f32[16,256], index: 9, kind: input, shape index: {}]   ;;  %s958_s10 = inlined_call_operand.hbm [shape: f32[8,256], index: 10, kind: output, shape index: {}]  }
   0x1   :  { %v69_v0 = vld [vmem:[%s949_s1 + $0xf8] sm:$0xff]  ;;  %v68_v2 = vld [vmem:[%s949_s1 + $0xf0] sm:$0xff]  ;;  %v67_v4 = vld [vmem:[%s949_s1 + $0xe8] sm:$0xff] }
   0x2   :  { %v53_v1 = vld [vmem:[%s949_s1 + $0x78] sm:$0xff]  ;;  %611 = vmatprep.subr.mxu0 %v69_v0  ;;  %v52_v3 = vld [vmem:[%s949_s1 + $0x70] sm:$0xff]  ;;  %v51_v5 = vld [vmem:[%s949_s1 + $0x68] sm:$0xff] }
   0x3   :  { %612 = vmatpush3.msra.mxu0 %v53_v1  ;;  %v66_v6 = vld [vmem:[%s949_s1 + $0xe0] sm:$0xff]  ;;  %v65_v8 = vld [vmem:[%s949_s1 + $0xd8] sm:$0xff]  ;;  %v64_v10 = vld [vmem:[%s949_s1 + $0xd0] sm:$0xff] }
   0x4   :  { %613 = vmatprep.subr.mxu0 %v68_v2  ;;  %v50_v7 = vld [vmem:[%s949_s1 + $0x60] sm:$0xff]  ;;  %v49_v9 = vld [vmem:[%s949_s1 + $0x58] sm:$0xff]  ;;  %v48_v11 = vld [vmem:[%s949_s1 + $0x50] sm:$0xff] }
   0x5   :  { %614 = vmatpush3.msra.mxu0 %v52_v3  ;;  %v63_v12 = vld [vmem:[%s949_s1 + $0xc8] sm:$0xff] }
   0x6   :  { %615 = vmatprep.subr.mxu0 %v67_v4  ;;  %v813_v13 = vld [vmem:[%s948_s0 + $0x8] sm:$0xff] }
   0x7   :  { %616 = vmatpush3.msra.mxu0 %v51_v5  ;;  %v47_v14 = vld [vmem:[%s949_s1 + $0x48] sm:$0xff]  ;;  %134 = vmatprep.mubr.f32.mxu0 %v813_v13 }
   0x8   :  { %617 = vmatprep.subr.mxu0 %v66_v6 }
   0x9   :  { %618 = vmatpush3.msra.mxu0 %v50_v7 }
   0xa   :  { %619 = vmatprep.subr.mxu0 %v65_v8 }
   0xb   :  { %620 = vmatpush3.msra.mxu0 %v49_v9 }
   0xc   :  { %621 = vmatprep.subr.mxu0 %v64_v10 }
   0xd   :  { %15 = vsyncpa [#allocation3], 0  ;;  %622 = vmatpush3.msra.mxu0 %v48_v11  ;;  %v62_v15 = vld [vmem:[%s949_s1 + $0xc0] sm:$0xff]  ;;  %v61_v17 = vld [vmem:[%s949_s1 + $0xb8] sm:$0xff]  ;;  %vm154_vm0 = vcmask 64512   ;;  %v711_v36 = vmov 0  }
   0xe   :  { %623 = vmatprep.subr.mxu0 %v63_v12  ;;  %v46_v16 = vld [vmem:[%s949_s1 + $0x40] sm:$0xff]  ;;  %v45_v18 = vld [vmem:[%s949_s1 + $0x38] sm:$0xff]  ;;  %v60_v19 = vld [vmem:[%s949_s1 + $0xb0] sm:$0xff]  ;;  %679 = vset.pattern.permute.xlu0 %v711_v36  ;;  %v712_v43 = vmov 0.0   ;;  %vm713_vm1 = vmmov 0   ;;  %vm253_vm2 = vcmask 130048  }
   0xf   :  { %624 = vmatpush3.msra.mxu0 %v47_v14  ;;  %v44_v20 = vld [vmem:[%s949_s1 + $0x30] sm:$0xff]  ;;  %v59_v21 = vld [vmem:[%s949_s1 + $0xa8] sm:$0xff]  ;;  %v58_v23 = vld [vmem:[%s949_s1 + $0xa0] sm:$0xff]  ;;  %680 = vset.pattern.permute.xlu1 %v711_v36 }
  0x10   :  { %625 = vmatprep.subr.mxu0 %v62_v15  ;;  %v43_v22 = vld [vmem:[%s949_s1 + $0x28] sm:$0xff]  ;;  %v42_v24 = vld [vmem:[%s949_s1 + $0x20] sm:$0xff]  ;;  %v57_v25 = vld [vmem:[%s949_s1 + $0x98] sm:$0xff] }
  0x11   :  { %626 = vmatpush3.msra.mxu0 %v46_v16  ;;  %v41_v26 = vld [vmem:[%s949_s1 + $0x18] sm:$0xff]  ;;  %v56_v27 = vld [vmem:[%s949_s1 + $0x90] sm:$0xff]  ;;  %v55_v29 = vld [vmem:[%s949_s1 + $0x88] sm:$0xff] }
  0x12   :  { %627 = vmatprep.subr.mxu0 %v61_v17  ;;  %v40_v28 = vld [vmem:[%s949_s1 + $0x10] sm:$0xff]  ;;  %v39_v30 = vld [vmem:[%s949_s1 + $0x8] sm:$0xff]  ;;  %v54_v31 = vld [vmem:[%s949_s1 + $0x80] sm:$0xff] }
  0x13   :  { %628 = vmatpush3.msra.mxu0 %v45_v18  ;;  %v38_v32 = vld [vmem:[%s949_s1] sm:$0xff]  ;;  %v143_v35 = vld [vmem:[%s951_s3 + $0x8] sm:$0xff]  ;;  %v430_v0 = vld [vmem:[%s956_s8 + $0x18] sm:$0xff] }
  0x14   :  { %629 = vmatprep.subr.mxu0 %v60_v19  ;;  %v876_v33 = vld [vmem:[%s948_s0] sm:$0xff]  ;;  %151 = vperm.xlu0 %679, %v143_v35   ;;  %v141_v42 = vld [vmem:[%s950_s2 + $0x8] sm:$0xff]  ;;  %v429_v2 = vld [vmem:[%s956_s8 + $0x10] sm:$0xff] }
  0x15   :  { %630 = vmatpush3.msra.mxu0 %v44_v20  ;;  %v140_v34 = vld [vmem:[%s950_s2] sm:$0xff]  ;;  %s714_s2 = smov 112   ;;  %v428_v3 = vld [vmem:[%s956_s8 + $0x8] sm:$0xff]  ;;  %v508_v10 = vld [vmem:[%s957_s9 + $0x18] sm:$0xff] }
  0x16   :  { %631 = vmatprep.subr.mxu0 %v59_v21  ;;  %657 = vmatprep.mubr.msk.f32.mxu1 %vm154_vm0, %v140_v34  ;;  %v142_v37 = vld [vmem:[%s951_s3] sm:$0xff]  ;;  %v507_v14 = vld [vmem:[%s957_s9 + $0x10] sm:$0xff]  ;;  %v506_v16 = vld [vmem:[%s957_s9 + $0x8] sm:$0xff] }
  0x17   :  { %632 = vmatpush3.msra.mxu0 %v43_v22  ;;  %v247_v38 = vld [vmem:[%s953_s5] sm:$0xff] }
  0x18   :  { %633 = vmatprep.subr.mxu0 %v58_v23  ;;  %146 = vperm.xlu0 %679, %v142_v37   ;;  %v246_v60 = vld [vmem:[%s952_s4] sm:$0xff] }
  0x19   :  { %634 = vmatpush3.msra.mxu0 %v42_v24  ;;  %v334_v61 = vld [vmem:[%s955_s7] sm:$0xff] }
  0x1a   :  { %635 = vmatprep.subr.mxu0 %v57_v25  ;;  %v333_v63 = vld [vmem:[%s954_s6] sm:$0xff] }
  0x1b   :  { %636 = vmatpush3.msra.mxu0 %v41_v26  ;;  %v427_v4 = vld [vmem:[%s956_s8] sm:$0xff] }
  0x1c   :  { %637 = vmatprep.subr.mxu0 %v56_v27  ;;  %250 = vperm.xlu0 %679, %v247_v38   ;;  %v505_v17 = vld [vmem:[%s957_s9] sm:$0xff]  ;;  %s715_s9 = smov [#allocation2]  }
  0x1d   :  { %638 = vmatpush3.msra.mxu0 %v40_v28  ;;  %s595_s0 = sshll.u32 %s715_s9, 4  ;;  %s596_s0 = int_to_ptr.vmem [resolvable:$true] %s595_s0 }
  0x1e   :  { %639 = vmatprep.subr.mxu0 %v55_v29  ;;  %s689_s1 = scalar_lea.vmem %s596_s0, 256  ;;  %p694_p1 = scmp.lt.s32.totalorder %s596_s0, %s596_s0 }
  0x1f   :  { %640 = vmatpush3.msra.mxu0 %v39_v30  ;;  %p690_p0 = scmp.ne.s32.totalorder %s596_s0, %s689_s1  ;;  %p695_p2 = scmp.lt.s32.totalorder %s689_s1, %s689_s1 }
  0x20   :  { %641 = vmatprep.subr.mxu0 %v54_v31 }
  0x21   :  { %642 = vmatpush3.msra.mxu0 %v38_v32  ;;  %p696_p3 = por %p695_p2, %p694_p1 }
  0x22   :  { %135 = vmatmul.mubr.f32.vlgmr.msra.gmra.mxu0 %v876_v33 }
  0x23   :  { %p697_p4 = pnand %p696_p3, %p690_p0 }
  0x8f   :  { %v152_v44 = vpop.permute.xlu0 %151 }
  0x93   :  { %v147_v47 = vpop.permute.xlu0 %146 }
  0x97   :  { %v251_v5 = vpop.permute.xlu0 %250 }
  0xe2   :  { %v643_v39 = vpop.f32.mrf.mxu0 }
  0xe4   :  { %v644_v40 = vpop.f32.mrf.mxu0 }
  0xe5   :  { %v645_v41 = vadd.f32 %v644_v40, %v643_v39 }
  0xe7   :  { %655 = vmatprep.subr.mxu1 %v645_v41 }
  0xe8   :  { %656 = vmatpush3.msra.mxu1 %v645_v41 }
  0xe9   :  { %658 = vmatmul.mubr.msk.f32.vlgmr.msra.gmra.mxu1 %vm154_vm0, %v141_v42  ;;  %660 = vmatprep.subr.mxu1 %v712_v43 }
  0xea   :  { %664 = vmatprep.mubr.msk.f32.mxu1 %vm713_vm1, %v712_v43 }
 0x1a9   :  { %v659_v45 = vpop.f32.mrf.mxu1 }
 0x1aa   :  { %v233_v46 = vadd.f32 %v659_v45, %v152_v44 }
 0x1ab   :  { %v227_v48 = vpop.f32.mrf.mxu1 }
 0x1ac   :  { %v237_v49 = vadd.f32 3.0, %v233_v46  ;;  %v228_v50 = vadd.f32 %v227_v48, %v147_v47 }
 0x1ae   :  { %v239_v51 = vmax.f32 %v237_v49, 0.0  ;;  %v236_v52 = vadd.f32 3.0, %v228_v50 }
 0x1b0   :  { %v241_v53 = vmin.f32 %v239_v51, 6.0  ;;  %v238_v54 = vmax.f32 %v236_v52, 0.0 }
 0x1b2   :  { %v240_v55 = vmin.f32 %v238_v54, 6.0  ;;  %v243_v56 = vmul.f32 0.16666667, %v241_v53 }
 0x1b4   :  { %v242_v57 = vmul.f32 0.16666667, %v240_v55  ;;  %v245_v58 = vmul.f32 %v243_v56, %v233_v46 }
 0x1b6   :  { %v244_v59 = vmul.f32 %v242_v57, %v228_v50  ;;  %344 = vrot.lane.b32.xlu1 %v245_v58, %s714_s2  ;;  %661 = vmatpush3.msra.mxu1 %v245_v58 }
 0x1b7   :  { %662 = vmatprep.subr.mxu1 %v712_v43 }
 0x1b8   :  { %663 = vmatpush3.msra.mxu1 %v244_v59 }
 0x1b9   :  { %665 = vmatmul.mubr.msk.f32.vlgmr.msra.gmra.mxu1 %vm253_vm2, %v246_v60  ;;  %667 = vmatprep.subr.mxu1 %v712_v43 }
 0x1ba   :  { %342 = vrot.lane.b32.xlu1 %v244_v59, %s714_s2  ;;  %671 = vmatprep.mubr.msk.f32.mxu1 %vm713_vm1, %v712_v43 }
 0x1be   :  { %337 = vperm.xlu1 %680, %v334_v61  }
 0x228   :  { %v345_v62 = vpop.permute.xlu1 %344 }
 0x229   :  { %668 = vmatpush3.msra.mxu1 %v345_v62 }
 0x22a   :  { %669 = vmatprep.subr.mxu1 %v712_v43 }
 0x22c   :  { %v343_v1 = vpop.permute.xlu1 %342 }
 0x22d   :  { %670 = vmatpush3.msra.mxu1 %v343_v1 }
 0x22e   :  { %672 = vmatmul.mubr.msk.f32.vlgmr.msra.gmra.mxu1 %vm253_vm2, %v333_v63  ;;  %462 = vmatprep.subr.mxu1 %v430_v0 }
 0x22f   :  { %463 = vmatpush1.msra.mxu1 %v429_v2  ;;  %498 = vmatprep.mubr.f32.mxu1 %v712_v43 }
 0x230   :  { %464 = vmatprep.subr.mxu1 %v428_v3 }
 0x231   :  { %465 = vmatpush1.msra.mxu1 %v427_v4 }
 0x232   :  { %540 = vmatprep.subr.mxu1 %v508_v10 }
 0x239   :  { %v338_v18 = vpop.permute.xlu1 %337 }
 0x279   :  { %v323_v6 = vpop.f32.mrf.mxu1 }
 0x27a   :  { %v324_v7 = vadd.f32 %v323_v6, %v251_v5 }
 0x27b   :  { %v666_v8 = vpop.f32.mrf.mxu1 }
 0x27c   :  { %v606_v9 = vmul.f32 -1.442695, %v324_v7 }
 0x27e   :  { %681 = vpow2.f32 %v606_v9 }
 0x28b   :  { %v682_v11 = vpop.eup %681 }
 0x28c   :  { %v330_v12 = vadd.f32 1.0, %v682_v11 }
 0x28e   :  { %683 = vrcp.f32 %v330_v12 }
 0x29b   :  { %v684_v15 = vpop.eup %683 }
 0x29c   :  { %609 = vmatmul.mubr.msk.f32.vlgmr.msra.gmra.mxu1 %vm253_vm2, %v684_v15 }
 0x29d   :  { %541 = vmatpush1.msra.mxu1 %v507_v14  ;;  %576 = vmatprep.mubr.f32.mxu1 %v712_v43 }
 0x29e   :  { %542 = vmatprep.subr.mxu1 %v506_v16 }
 0x29f   :  { %543 = vmatpush1.msra.mxu1 %v505_v17 }
 0x2ee   :  { %v417_v19 = vpop.f32.mrf.mxu1 }
 0x2ef   :  { %v418_v20 = vadd.f32 %v417_v19, %v338_v18 }
 0x2f0   :  { %v673_v21 = vpop.f32.mrf.mxu1 }
 0x2f1   :  { %v608_v22 = vmul.f32 -1.442695, %v418_v20 }
 0x2f3   :  { %685 = vpow2.f32 %v608_v22 }
 0x300   :  { %v686_v23 = vpop.eup %685 }
 0x301   :  { %v424_v24 = vadd.f32 1.0, %v686_v23 }
 0x303   :  { %687 = vrcp.f32 %v424_v24 }
 0x310   :  { %v688_v25 = vpop.eup %687 }
 0x311   :  { %610 = vmatmul.mubr.msk.f32.vlgmr.msra.gmra.mxu1 %vm253_vm2, %v688_v25 }
 0x35c   :  { %v500_v26 = vpop.f32.mrf.mxu1 }
 0x35d   :  { %v583_v28 = vmul.f32 %v500_v26, %v876_v33 }
 0x35e   :  { %v502_v27 = vpop.f32.mrf.mxu1 }
 0x35f   :  { %v584_v30 = vmul.f32 %v502_v27, %v813_v13 }
 0x3d1   :  { %v578_v29 = vpop.f32.mrf.mxu1 }
 0x3d2   :  { %v585_v31 = vmul.f32 %v583_v28, %v578_v29 }
 0x3d3   :  { %v580_v32 = vpop.f32.mrf.mxu1 }
 0x3d4   :  { %587 = vst [vmem:[#allocation2] sm:$0xff] %v585_v31  ;;  %v586_v34 = vmul.f32 %v584_v30, %v580_v32 }
 0x3d6   :  { %588 = vst [vmem:[#allocation2 + $0x8] sm:$0xff] %v586_v34 }
 0x3d7   :  { %700 = shalt.err (!%p697_p4)
}
 0x3d8   :  { %598 = dma.vmem_to_hbm [thread:$0]  %s596_s0, 256, %s958_s10, [#allocation3]  }
 0x3d9   :  { %709 = dma.done.wait [#allocation3], 256  }
 0x3da   :  { %710 = vsyncadd [#allocation3], 4294967040 }
 0x3db   :  { %602 = vsyncpa [#allocation3], 1 }

</bundles_post_ra>
